<compile_context>
chip_gen: v5e
topology: v5e:2x2
jax: 0.10.0
libtpu: 0.0.40
codegen_flags: <defaults>
</compile_context>

<pallas_src>
import jax
import jax.numpy as jnp
from jax import lax
from jax.experimental import pallas as pl
from jax.experimental.pallas import tpu as pltpu

N_EMBD = 384        # module constant in bigram.py; Head scales scores by C**-0.5
HEAD_SIZE = 64      # bigram.py instantiates Head(head_size = n_embd // n_head = 64)
BLOCK_SIZE = 256    # size of the registered tril buffer (max T)
NEG_BIG = -1e30     # finite "masked" score, avoids inf/NaN special-case handling
SCALE = N_EMBD ** -0.5


def head_kernel(x_ref, wqkv_ref, o_ref):
    x = x_ref[0]                                    # (T, C) fp32
    T = x.shape[0]
    x_bf = x.astype(jnp.bfloat16)                   # bf16 MXU operands

    # Fused q/k/v projection: one (T,C) @ (C,3H) matmul, fp32 accumulation.
    qkv = jnp.dot(x_bf, wqkv_ref[...], preferred_element_type=jnp.float32)  # (T, 3H)
    q = qkv[:, :HEAD_SIZE] * SCALE                  # fold C**-0.5 into q (T,H)
    k = qkv[:, HEAD_SIZE:2 * HEAD_SIZE]
    v = qkv[:, 2 * HEAD_SIZE:]

    # Scores: q @ k^T via dot_general (contract dim 1 of both) -> no transpose.
    wei = lax.dot_general(
        q.astype(jnp.bfloat16), k.astype(jnp.bfloat16),
        dimension_numbers=(((1,), (1,)), ((), ())),
        preferred_element_type=jnp.float32,
    )                                               # (T, T), already scaled via q

    # Causal mask with a finite large-negative constant (tril buffer equivalent).
    row = lax.broadcasted_iota(jnp.int32, (T, T), 0)
    col = lax.broadcasted_iota(jnp.int32, (T, T), 1)
    wei = jnp.where(row >= col, wei, NEG_BIG)

    # Numerically stable softmax in fp32; divide -> EUP approx reciprocal + mul.
    wei = wei - jnp.max(wei, axis=-1, keepdims=True)
    e = jnp.exp(wei)
    p = e * pl.reciprocal(jnp.sum(e, axis=-1, keepdims=True), approx=True)
    # attention dropout is identity in eval mode

    out = jnp.dot(p.astype(jnp.bfloat16), v.astype(jnp.bfloat16),
                  preferred_element_type=jnp.float32)
    o_ref[0] = out.astype(o_ref.dtype)


def head_forward(x, params):
    """x: (B, T, C) float32 with T <= BLOCK_SIZE. params: wk/wq/wv each (C, H)."""
    B, T, C = x.shape
    assert C == N_EMBD and T <= BLOCK_SIZE

    # Pack [q | k | v] projection weights once: bf16 halves weight DMA/VMEM,
    # fusing gives a single projection matmul in the kernel.
    wqkv = jnp.concatenate(
        [params["wq"], params["wk"], params["wv"]], axis=1).astype(jnp.bfloat16)

    return pl.pallas_call(
        head_kernel,
        out_shape=jax.ShapeDtypeStruct((B, T, HEAD_SIZE), x.dtype),
        grid_spec=pltpu.PrefetchScalarGridSpec(
            num_scalar_prefetch=0,
            grid=(B,),
            in_specs=[pl.BlockSpec((1, T, C), lambda b: (b, 0, 0)),
                      # same block index every step -> weights stay VMEM-resident
                      pl.BlockSpec((C, 3 * HEAD_SIZE), lambda b: (0, 0))],
            out_specs=pl.BlockSpec((1, T, HEAD_SIZE), lambda b: (b, 0, 0)),
        ),
        compiler_params=pltpu.CompilerParams(
            dimension_semantics=("parallel",),
            # no vmem_limit_bytes override: kernel needs <1 MiB, valid on v7x's
            # 64 MiB VMEM and v5e/v6e's 128 MiB without any special limit.
        ),
    )(x, wqkv)


def head_reference(x, params):
    """Pure-JAX fp32 reference of the PyTorch Head.forward (eval mode)."""
    B, T, C = x.shape
    k = x @ params["wk"]
    q = x @ params["wq"]
    v = x @ params["wv"]
    wei = jnp.einsum("btd,bsd->bts", q, k) * (C ** -0.5)
    mask = jnp.tril(jnp.ones((T, T), dtype=bool))
    wei = jnp.where(mask, wei, -jnp.inf)
    wei = jax.nn.softmax(wei, axis=-1)
    return jnp.einsum("bts,bsd->btd", wei, v)


def init_params(key):
    ks = jax.random.split(key, 3)
    s = 0.02
    return {
        # stored (in, out) so y = x @ W matches torch.nn.Linear (W = weight.T)
        "wk": jax.random.normal(ks[0], (N_EMBD, HEAD_SIZE), jnp.float32) * s,
        "wq": jax.random.normal(ks[1], (N_EMBD, HEAD_SIZE), jnp.float32) * s,
        "wv": jax.random.normal(ks[2], (N_EMBD, HEAD_SIZE), jnp.float32) * s,
    }


if __name__ == "__main__":
    key = jax.random.PRNGKey(0)
    kx, kp = jax.random.split(key)

    B, T = 2, 64                        # T <= block_size (256); kept small
    x = jax.random.normal(kx, (B, T, N_EMBD), jnp.float32)
    params = init_params(kp)

    out = jax.block_until_ready(head_forward(x, params))
    ref = jax.block_until_ready(head_reference(x, params))

    assert out.shape == (B, T, HEAD_SIZE)
    assert jnp.allclose(out, ref, rtol=1e-2, atol=1e-2), \
        f"max abs diff {jnp.max(jnp.abs(out - ref))}"

    print("KERNEL_OK")
</pallas_src>

<mosaic_0001>
module attributes {stable_mosaic.version = 11 : i64} {
  func.func @head_kernel(%arg0: i32, %arg1: memref<1x64x384xf32, #tpu.memory_space<vmem>>, %arg2: memref<384x192xbf16, #tpu.memory_space<vmem>>, %arg3: memref<1x64x64xf32, #tpu.memory_space<vmem>>) attributes {dimension_semantics = [#tpu.dimension_semantics<parallel>], iteration_bounds = array<i64: 2>, scalar_prefetch = 0 : i64, scratch_operands = 0 : i64, tpu.core_type = #tpu.core_type<tc>, window_params = [{transform_indices = @transform_0, window_bounds = array<i64: 1, 64, 384>}, {pipeline_mode = #tpu.pipeline_mode<synchronous>, transform_indices = @transform_1, window_bounds = array<i64: 384, 192>}, {transform_indices = @transform_2, window_bounds = array<i64: 1, 64, 64>}]} {
    %c0 = arith.constant 0 : index
    %c0_0 = arith.constant 0 : index
    %c0_1 = arith.constant 0 : index
    %0 = vector.load %arg1[%c0, %c0_0, %c0_1] : memref<1x64x384xf32, #tpu.memory_space<vmem>>, vector<1x64x384xf32>
    %1 = vector.shape_cast %0 : vector<1x64x384xf32> to vector<64x384xf32>
    %2 = arith.truncf %1 : vector<64x384xf32> to vector<64x384xbf16>
    %c0_2 = arith.constant 0 : index
    %c0_3 = arith.constant 0 : index
    %3 = vector.load %arg2[%c0_2, %c0_3] : memref<384x192xbf16, #tpu.memory_space<vmem>>, vector<384x192xbf16>
    %cst = arith.constant dense<0.000000e+00> : vector<64x192xf32>
    %4 = tpu.matmul %2, %3, %cst {dimension_numbers = #tpu.dot_dimension_numbers<[1], [0], [0], [1], [0, 0, 1, 1], [], []>} : vector<64x384xbf16>, vector<384x192xbf16>, vector<64x192xf32> -> vector<64x192xf32>
    %5 = vector.extract_strided_slice %4 {offsets = [0, 0], sizes = [64, 64], strides = [1, 1]} : vector<64x192xf32> to vector<64x64xf32>
    %cst_4 = arith.constant 0.0510310382 : f32
    %6 = vector.broadcast %cst_4 : f32 to vector<64x64xf32>
    %7 = arith.mulf %5, %6 : vector<64x64xf32>
    %8 = vector.extract_strided_slice %4 {offsets = [0, 64], sizes = [64, 64], strides = [1, 1]} : vector<64x192xf32> to vector<64x64xf32>
    %9 = vector.extract_strided_slice %4 {offsets = [0, 128], sizes = [64, 64], strides = [1, 1]} : vector<64x192xf32> to vector<64x64xf32>
    %10 = arith.truncf %7 : vector<64x64xf32> to vector<64x64xbf16>
    %11 = arith.truncf %8 : vector<64x64xf32> to vector<64x64xbf16>
    %cst_5 = arith.constant dense<0.000000e+00> : vector<64x64xf32>
    %12 = tpu.matmul %10, %11, %cst_5 {dimension_numbers = #tpu.dot_dimension_numbers<[1], [1], [0], [0], [0, 0, 1, 0], [], []>} : vector<64x64xbf16>, vector<64x64xbf16>, vector<64x64xf32> -> vector<64x64xf32>
    %13 = tpu.iota {dimensions = array<i32: 0>} : vector<64x64xi32>
    %14 = tpu.iota {dimensions = array<i32: 1>} : vector<64x64xi32>
    %15 = arith.cmpi sge, %13, %14 : vector<64x64xi32>
    %cst_6 = arith.constant -1.000000e+30 : f32
    %16 = vector.broadcast %cst_6 : f32 to vector<64x64xf32>
    %17 = arith.select %15, %12, %16 : vector<64x64xi1>, vector<64x64xf32>
    %cst_7 = arith.constant dense<0xFF800000> : vector<64xf32>
    %18 = vector.multi_reduction <maximumf>, %17, %cst_7 [1] : vector<64x64xf32> to vector<64xf32>
    %19 = vector.shape_cast %18 : vector<64xf32> to vector<64x1xf32>
    %20 = vector.broadcast %19 : vector<64x1xf32> to vector<64x64xf32>
    %21 = arith.subf %17, %20 : vector<64x64xf32>
    %22 = math.exp %21 : vector<64x64xf32>
    %cst_8 = arith.constant dense<0.000000e+00> : vector<64xf32>
    %23 = vector.multi_reduction <add>, %22, %cst_8 [1] : vector<64x64xf32> to vector<64xf32>
    %24 = vector.shape_cast %23 : vector<64xf32> to vector<64x1xf32>
    %25 = tpu.reciprocal %24 {approx = true} : vector<64x1xf32> -> vector<64x1xf32>
    %26 = vector.broadcast %25 : vector<64x1xf32> to vector<64x64xf32>
    %27 = arith.mulf %22, %26 : vector<64x64xf32>
    %28 = arith.truncf %27 : vector<64x64xf32> to vector<64x64xbf16>
    %29 = arith.truncf %9 : vector<64x64xf32> to vector<64x64xbf16>
    %cst_9 = arith.constant dense<0.000000e+00> : vector<64x64xf32>
    %30 = tpu.matmul %28, %29, %cst_9 {dimension_numbers = #tpu.dot_dimension_numbers<[1], [0], [0], [1], [0, 0, 1, 1], [], []>} : vector<64x64xbf16>, vector<64x64xbf16>, vector<64x64xf32> -> vector<64x64xf32>
    %c0_10 = arith.constant 0 : index
    %c0_11 = arith.constant 0 : index
    %c0_12 = arith.constant 0 : index
    %31 = vector.load %arg3[%c0_10, %c0_11, %c0_12] : memref<1x64x64xf32, #tpu.memory_space<vmem>>, vector<1x64x64xf32>
    %32 = vector.shape_cast %31 : vector<1x64x64xf32> to vector<64x64xf32>
    %33 = vector.shape_cast %30 : vector<64x64xf32> to vector<1x64x64xf32>
    tpu.vector_store %arg3[%c0_10, %c0_11, %c0_12], %33 {strides = array<i32>} : memref<1x64x64xf32, #tpu.memory_space<vmem>>, vector<1x64x64xf32>,
    return
  }
  func.func @transform_0(%arg0: i32) -> (i32, i32, i32) {
    %c0_i32 = arith.constant 0 : i32
    %c0_i32_0 = arith.constant 0 : i32
    %c0_i32_1 = arith.constant 0 : i32
    return %arg0, %c0_i32, %c0_i32_0 : i32, i32, i32
  }
  func.func @transform_1(%arg0: i32) -> (i32, i32) {
    %c0_i32 = arith.constant 0 : i32
    %c0_i32_0 = arith.constant 0 : i32
    %c0_i32_1 = arith.constant 0 : i32
    return %c0_i32, %c0_i32_0 : i32, i32
  }
  func.func @transform_2(%arg0: i32) -> (i32, i32, i32) {
    %c0_i32 = arith.constant 0 : i32
    %c0_i32_0 = arith.constant 0 : i32
    %c0_i32_1 = arith.constant 0 : i32
    return %arg0, %c0_i32, %c0_i32_0 : i32, i32, i32
  }
}

</mosaic_0001>

<bundles_post_ra>
// kernel: tpu_custom_call.1
= control target key start
LH: loop header
LB: loop body
LE: loop exit
PB: predicated region body
PF: predicated region fallthrough
CT: control target
= control target key end

     0   :  { %7 = vsyncpa [#allocation3], 0  ;;  %s1941_s0 = inlined_call_operand.vmem [shape: f32[2,64,384], index: 0, kind: input, shape index: {}]   ;;  %s1942_s1 = inlined_call_operand.vmem [shape: bf16[384,192], index: 1, kind: input, shape index: {}]   ;;  %s1943_s2 = inlined_call_operand.hbm [shape: f32[2,64,64], index: 2, kind: output, shape index: {}]  }
   0x1   :  { %9 = vsyncpa [#allocation3 + $0x1], 0  ;;  %s1390_s9 = smov 0   ;;  %s1392_s10 = smov 0  }
   0x2   :  { %s1394_s11 = smov 0   ;;  %s1396_s12 = smov 0  }
   0x3 LB: > { %s1411_s13 = sadd.s32 4294967295, %s1370_s12   ;;  %s973_s14 = sadd.s32 4294967294, %s1370_s12   ;;  %s1370_s12 = sphi %s1396_s12, %s1949_s12   ;;  %s1366_s11 = sphi %s1394_s11, %s1948_s11   ;;  %s1362_s10 = sphi %s1392_s10, %s1947_s10   ;;  %s1358_s9 = sphi %s1390_s9, %s1946_s9  }
   0x4   : > { %s1415_s15 = sadd.s32 1, %s1370_s12   ;;  %s69_s16 = sadd.s32 1, %s1366_s11 }
   0x5   : > { %s66_s17 = ssub.s32 %s1370_s12, %s1415_s15  ;;  %p79_p0 = scmp.ne.s32.totalorder %s1366_s11, %s1362_s10 }
   0x6   : > { %p67_p1 = scmp.eq.s32.totalorder %s66_s17, 0  ;;  %p80_p2 = scmp.eq.s32.totalorder %s1411_s13, 1 }
   0x7   : > { %p85_p3 = scmp.ne.s32.totalorder %s1362_s10, %s1358_s9  ;;  %p86_p4 = scmp.eq.s32.totalorder %s973_s14, 1 }
   0x8   : > { %s1426_s18 = scalar_select %p67_p1, %s1366_s11, %s69_s16  }
   0x9   : > { %p1428_p5 = por %p80_p2, %p79_p0  ;;  %p1432_p6 = por %p86_p4, %p85_p3 }
   0xa   : > { %p976_p7 = scmp.ge.s32.totalorder %s1370_s12, 1  ;;  %p115_p8 = scmp.lt.s32.totalorder %s1370_s12, 3 }
   0xc   : > { %p116_p9 = pnand %p976_p7, %p115_p8 }
   0xd   : > { %p137_p10 = scmp.lt.s32.totalorder (!%p116_p9), %s1411_s13, 1  ;;  %s134_s29 = sand.u32 (!%p116_p9), 1, %s1362_s10  }
   0xe   : > { %119 = sbr.rel (%p116_p9) target bundleno = 983 (0x3d7), region = 28  ;;  %s977_s30 = sshll.u32 (!%p116_p9), %s134_s29, 6 }
   0xf   : > { %s136_s3 = scalar_lea.vmem (!%p116_p9), [#allocation2], %s977_s30  ;;  %s1232_s4 = sshll.u32 (!%p116_p9), %s1411_s13, 6 }
  0x10   : > { %s907_s7 = scalar_lea.hbm (!%p116_p9), %s1943_s2, %s1232_s4  ;;  %s896_s16 = scalar_lea.sflag (!%p116_p9), [#allocation3], %s134_s29 }
  0x11   : > { %s910_s14 = sshll.u32 (!%p116_p9), %s907_s7, 4  ;;  %s1328_s23 = scalar_lea.hbm (!%p116_p9), %s1943_s2, 128  ;;  %s911_s14 = int_to_ptr.hbm [resolvable:$true] %s910_s14 }
  0x13   : > { %v1037_v0 = vld [vmem:[%s1942_s1 + $0x70] sm:$0xf]  ;;  %v1199_v1 = vld [vmem:[%s1942_s1 + $0x74] sm:$0xf0]  ;;  %v1029_v9 = vld [vmem:[%s1942_s1 + $0x60] sm:$0xf] }
  0x14   : > { %v1101_v2 = vld [vmem:[%s1942_s1 + $0xf0] sm:$0xf]  ;;  %v1038_v3 = vor.u32 %v1199_v1, %v1037_v0  ;;  %v1215_v4 = vld [vmem:[%s1942_s1 + $0xf4] sm:$0xf0]  ;;  %v1197_v10 = vld [vmem:[%s1942_s1 + $0x64] sm:$0xf0] }
  0x15   : > { %v1165_v5 = vld [vmem:[%s1942_s1 + $0x170] sm:$0xf]  ;;  %v1231_v6 = vld [vmem:[%s1942_s1 + $0x174] sm:$0xf0]  ;;  %v1102_v7 = vor.u32 %v1215_v4, %v1101_v2  ;;  %v1093_v11 = vld [vmem:[%s1942_s1 + $0xe0] sm:$0xf]  ;;  %v1030_v12 = vor.u32 %v1197_v10, %v1029_v9 }
  0x16   : > { %v1166_v8 = vor.u32 %v1231_v6, %v1165_v5  ;;  %467 = vmatpush.bf16.msra.mxu0 %v1038_v3  ;;  %v1213_v13 = vld [vmem:[%s1942_s1 + $0xe4] sm:$0xf0]  ;;  %v1157_v14 = vld [vmem:[%s1942_s1 + $0x160] sm:$0xf]  ;;  %v1021_v18 = vld [vmem:[%s1942_s1 + $0x50] sm:$0xf] }
  0x17   : > { %v1229_v15 = vld [vmem:[%s1942_s1 + $0x164] sm:$0xf0]  ;;  %496 = vmatpush.bf16.msra.mxu1 %v1102_v7  ;;  %v1094_v16 = vor.u32 %v1213_v13, %v1093_v11  ;;  %v1195_v19 = vld [vmem:[%s1942_s1 + $0x54] sm:$0xf0]  ;;  %v1085_v20 = vld [vmem:[%s1942_s1 + $0xd0] sm:$0xf] }
  0x18   : > { %525 = vmatpush.bf16.msra.mxu2 %v1166_v8  ;;  %v1158_v17 = vor.u32 %v1229_v15, %v1157_v14  ;;  %v1211_v21 = vld [vmem:[%s1942_s1 + $0xd4] sm:$0xf0]  ;;  %v1149_v22 = vld [vmem:[%s1942_s1 + $0x150] sm:$0xf]  ;;  %v1022_v24 = vor.u32 %v1195_v19, %v1021_v18  ;;  %v1013_v27 = vld [vmem:[%s1942_s1 + $0x40] sm:$0xf] }
  0x19   : > { %v1227_v23 = vld [vmem:[%s1942_s1 + $0x154] sm:$0xf0]  ;;  %v1086_v25 = vor.u32 %v1211_v21, %v1085_v20  ;;  %v1193_v28 = vld [vmem:[%s1942_s1 + $0x44] sm:$0xf0]  ;;  %v1077_v29 = vld [vmem:[%s1942_s1 + $0xc0] sm:$0xf] }
  0x1a   : > { %468 = vmatpush.bf16.msra.mxu0 %v1030_v12  ;;  %v1150_v26 = vor.u32 %v1227_v23, %v1149_v22  ;;  %v1209_v30 = vld [vmem:[%s1942_s1 + $0xc4] sm:$0xf0]  ;;  %v1141_v31 = vld [vmem:[%s1942_s1 + $0x140] sm:$0xf]  ;;  %v1014_v33 = vor.u32 %v1193_v28, %v1013_v27  ;;  %v1005_v36 = vld [vmem:[%s1942_s1 + $0x30] sm:$0xf] }
  0x1b   : > { %497 = vmatpush.bf16.msra.mxu1 %v1094_v16  ;;  %v1225_v32 = vld [vmem:[%s1942_s1 + $0x144] sm:$0xf0]  ;;  %v1078_v34 = vor.u32 %v1209_v30, %v1077_v29  ;;  %v1191_v37 = vld [vmem:[%s1942_s1 + $0x34] sm:$0xf0]  ;;  %v1069_v38 = vld [vmem:[%s1942_s1 + $0xb0] sm:$0xf] }
  0x1c   : > { %526 = vmatpush.bf16.msra.mxu2 %v1158_v17  ;;  %v1142_v35 = vor.u32 %v1225_v32, %v1141_v31  ;;  %v1207_v39 = vld [vmem:[%s1942_s1 + $0xb4] sm:$0xf0]  ;;  %v1133_v40 = vld [vmem:[%s1942_s1 + $0x130] sm:$0xf]  ;;  %v1006_v42 = vor.u32 %v1191_v37, %v1005_v36  ;;  %v997_v43 = vld [vmem:[%s1942_s1 + $0x20] sm:$0xf] }
  0x1d   : > { %v1223_v41 = vld [vmem:[%s1942_s1 + $0x134] sm:$0xf0]  ;;  %v1070_v44 = vor.u32 %v1207_v39, %v1069_v38  ;;  %v1189_v46 = vld [vmem:[%s1942_s1 + $0x24] sm:$0xf0]  ;;  %v1061_v47 = vld [vmem:[%s1942_s1 + $0xa0] sm:$0xf] }
  0x1e   : > { %469 = vmatpush.bf16.msra.mxu0 %v1022_v24  ;;  %v1134_v45 = vor.u32 %v1223_v41, %v1133_v40  ;;  %v1205_v48 = vld [vmem:[%s1942_s1 + $0xa4] sm:$0xf0]  ;;  %v1125_v49 = vld [vmem:[%s1942_s1 + $0x120] sm:$0xf]  ;;  %s138_s8 = scalar_select %p137_p10, %s1411_s13, 1  ;;  %v998_v51 = vor.u32 %v1189_v46, %v997_v43  ;;  %vm669_vm0 = vcmask 523264  }
  0x1f   : > { %498 = vmatpush.bf16.msra.mxu1 %v1086_v25  ;;  %v1221_v50 = vld [vmem:[%s1942_s1 + $0x124] sm:$0xf0]  ;;  %v989_v52 = vld [vmem:[%s1942_s1 + $0x10] sm:$0xf]  ;;  %v1062_v53 = vor.u32 %v1205_v48, %v1061_v47  ;;  %v1187_v55 = vld [vmem:[%s1942_s1 + $0x14] sm:$0xf0] }
  0x20   : > { %527 = vmatpush.bf16.msra.mxu2 %v1150_v26  ;;  %v1126_v54 = vor.u32 %v1221_v50, %v1125_v49  ;;  %v1053_v56 = vld [vmem:[%s1942_s1 + $0x90] sm:$0xf]  ;;  %s1233_s24 = smul.u32 192, %s138_s8  ;;  %v1203_v57 = vld [vmem:[%s1942_s1 + $0x94] sm:$0xf0]  ;;  %v990_v60 = vor.u32 %v1187_v55, %v989_v52  ;;  %s908_s8 = sshll.u32 %s136_s3, 4  ;;  %s909_s8 = int_to_ptr.vmem [resolvable:$true] %s908_s8 }
  0x21   : > { %v1117_v58 = vld [vmem:[%s1942_s1 + $0x110] sm:$0xf]  ;;  %v1219_v59 = vld [vmem:[%s1942_s1 + $0x114] sm:$0xf0]  ;;  %v1054_v61 = vor.u32 %v1203_v57, %v1053_v56  ;;  %v981_v63 = vld [vmem:[%s1942_s1] sm:$0xf] }
  0x22   : > { %470 = vmatpush.bf16.msra.mxu0 %v1014_v33  ;;  %v1118_v62 = vor.u32 %v1219_v59, %v1117_v58  ;;  %v1185_v0 = vld [vmem:[%s1942_s1 + $0x4] sm:$0xf0]  ;;  %v1045_v1 = vld [vmem:[%s1942_s1 + $0x80] sm:$0xf]  ;;  %s1578_s17 = scalar_lea.vmem %s1941_s0, %s1233_s24  ;;  %s1372_s24 = smov 64  }
  0x23   : > { %499 = vmatpush.bf16.msra.mxu1 %v1078_v34  ;;  %v1201_v2 = vld [vmem:[%s1942_s1 + $0x84] sm:$0xf0]  ;;  %v1109_v3 = vld [vmem:[%s1942_s1 + $0x100] sm:$0xf]  ;;  %v982_v5 = vor.u32 %v1185_v0, %v981_v63  ;;  %v146_v7 = vld [vmem:[%s1578_s17 + $0x18] sm:$0xff] }
  0x24   : > { %528 = vmatpush.bf16.msra.mxu2 %v1142_v35  ;;  %v1217_v4 = vld [vmem:[%s1942_s1 + $0x104] sm:$0xf0]  ;;  %v143_v6 = vld [vmem:[%s1578_s17] sm:$0xff]  ;;  %v1046_v9 = vor.u32 %v1201_v2, %v1045_v1  ;;  %v145_v12 = vld [vmem:[%s1578_s17 + $0x10] sm:$0xff] }
  0x25   : > { %v144_v8 = vld [vmem:[%s1578_s17 + $0x8] sm:$0xff]  ;;  %v1110_v10 = vor.u32 %v1217_v4, %v1109_v3  ;;  %v147_v11 = vld [vmem:[%s1578_s17 + $0x20] sm:$0xff]  ;;  %v1595_v14 = vpack.c.bf16 %v146_v7, %v143_v6  ;;  %v149_v17 = vld [vmem:[%s1578_s17 + $0x30] sm:$0xff] }
  0x26   : > { %471 = vmatpush.bf16.msra.mxu0 %v1006_v42  ;;  %v148_v13 = vld [vmem:[%s1578_s17 + $0x28] sm:$0xff]  ;;  %v1597_v15 = vpack.c.bf16 %v147_v11, %v144_v8  ;;  %v150_v19 = vld [vmem:[%s1578_s17 + $0x38] sm:$0xff]  ;;  %v153_v20 = vld [vmem:[%s1578_s17 + $0x50] sm:$0xff] }
  0x27   : > { %500 = vmatpush.bf16.msra.mxu1 %v1070_v44  ;;  %v1599_v16 = vpack.c.bf16 %v148_v13, %v145_v12  ;;  %v152_v18 = vld [vmem:[%s1578_s17 + $0x48] sm:$0xff]  ;;  %v151_v21 = vld [vmem:[%s1578_s17 + $0x40] sm:$0xff]  ;;  %v154_v22 = vld [vmem:[%s1578_s17 + $0x58] sm:$0xff]  ;;  %v1612_v24 = vpack.c.bf16 %v153_v20, %v150_v19 }
  0x28   : > { %529 = vmatpush.bf16.msra.mxu2 %v1134_v45  ;;  %v1610_v23 = vpack.c.bf16 %v152_v18, %v149_v17  ;;  %v1614_v25 = vpack.c.bf16 %v154_v22, %v151_v21  ;;  %v155_v26 = vld [vmem:[%s1578_s17 + $0x60] sm:$0xff]  ;;  %v158_v27 = vld [vmem:[%s1578_s17 + $0x78] sm:$0xff]  ;;  %v156_v28 = vld [vmem:[%s1578_s17 + $0x68] sm:$0xff] }
  0x29   : > { %v159_v29 = vld [vmem:[%s1578_s17 + $0x80] sm:$0xff]  ;;  %v157_v30 = vld [vmem:[%s1578_s17 + $0x70] sm:$0xff]  ;;  %v160_v31 = vld [vmem:[%s1578_s17 + $0x88] sm:$0xff]  ;;  %v1625_v32 = vpack.c.bf16 %v158_v27, %v155_v26 }
  0x2a   : > { %472 = vmatpush.bf16.msra.mxu0 %v998_v51  ;;  %v1627_v33 = vpack.c.bf16 %v159_v29, %v156_v28  ;;  %v1629_v34 = vpack.c.bf16 %v160_v31, %v157_v30  ;;  %v161_v35 = vld [vmem:[%s1578_s17 + $0x90] sm:$0xff]  ;;  %v164_v36 = vld [vmem:[%s1578_s17 + $0xa8] sm:$0xff]  ;;  %v162_v37 = vld [vmem:[%s1578_s17 + $0x98] sm:$0xff] }
  0x2b   : > { %501 = vmatpush.bf16.msra.mxu1 %v1062_v53  ;;  %v165_v38 = vld [vmem:[%s1578_s17 + $0xb0] sm:$0xff]  ;;  %v163_v39 = vld [vmem:[%s1578_s17 + $0xa0] sm:$0xff]  ;;  %v166_v40 = vld [vmem:[%s1578_s17 + $0xb8] sm:$0xff]  ;;  %v1640_v41 = vpack.c.bf16 %v164_v36, %v161_v35  ;;  %s1322_s17 = sshra.s32 %s911_s14, 4  ;;  %s1323_s17 = int_to_ptr.hbm [resolvable:$true] %s1322_s17 }
  0x2c   : > { %530 = vmatpush.bf16.msra.mxu2 %v1126_v54  ;;  %v1642_v42 = vpack.c.bf16 %v165_v38, %v162_v37  ;;  %v1644_v43 = vpack.c.bf16 %v166_v40, %v163_v39  ;;  %s1324_s21 = scalar_lea.hbm %s1323_s17, 64  ;;  %p1329_p0 = scmp.lt.s32.totalorder %s1323_s17, %s1943_s2 }
  0x2d   : > { %p1325_p11 = scmp.ne.s32.totalorder %s1323_s17, %s1324_s21  ;;  %p1330_p1 = scmp.lt.s32.totalorder %s1328_s23, %s1324_s21 }
  0x2e   : > { %473 = vmatpush.bf16.msra.mxu0 %v990_v60 }
  0x2f   : > { %502 = vmatpush.bf16.msra.mxu1 %v1054_v61  ;;  %p1326_p12 = pnand %p1325_p11, %p1428_p5  ;;  %p1331_p2 = por %p1330_p1, %p1329_p0 }
  0x30   : > { %531 = vmatpush.bf16.msra.mxu2 %v1118_v62 }
  0x31   : > { %p1327_p13 = pneg %p1326_p12 }
  0x32   : > { %474 = vmatpush.bf16.msra.mxu0 %v982_v5 }
  0x33   : > { %503 = vmatpush.bf16.msra.mxu1 %v1046_v9  ;;  %p1332_p3 = pnand %p1331_p2, %p1327_p13 }
  0x34   : > { %532 = vmatpush.bf16.msra.mxu2 %v1110_v10 }
  0x35   : > { %475 = vmatmul.bf16.vlgmr.msra.gmra.mxu0 %v1595_v14 }
  0x36   : > { %504 = vmatmul.bf16.vlgmr.msra.gmra.mxu1 %v1597_v15 }
  0x37   : > { %533 = vmatmul.bf16.vlgmr.msra.gmra.mxu2 %v1599_v16 }
  0x45   : > { %480 = vmatmul.bf16.gmra.mxu0 %v1610_v23 }
  0x46   : > { %509 = vmatmul.bf16.gmra.mxu1 %v1612_v24 }
  0x47   : > { %538 = vmatmul.bf16.gmra.mxu2 %v1614_v25 }
  0x55   : > { %485 = vmatmul.bf16.gmra.mxu0 %v1625_v32 }
  0x56   : > { %514 = vmatmul.bf16.gmra.mxu1 %v1627_v33 }
  0x57   : > { %543 = vmatmul.bf16.gmra.mxu2 %v1629_v34 }
  0x65   : > { %490 = vmatmul.bf16.gmra.mxu0 %v1640_v41 }
  0x66   : > { %519 = vmatmul.bf16.gmra.mxu1 %v1642_v42 }
  0x67   : > { %548 = vmatmul.bf16.gmra.mxu2 %v1644_v43 }
  0xb2   : > { %v476_v44 = vpop.f32.mrf.mxu0 }
  0xb3   : > { %v505_v45 = vpop.f32.mrf.mxu1 }
  0xb4   : > { %v506_v49 = vadd.f32 %v505_v45, %v476_v44 }
  0xba   : > { %v534_v46 = vpop.f32.mrf.mxu2  ;;  %v478_v47 = vpop.f32.mrf.mxu0 }
  0xbb   : > { %v507_v48 = vpop.f32.mrf.mxu1  ;;  %v535_v50 = vadd.f32 %v534_v46, %v506_v49 }
  0xbc   : > { %v508_v51 = vadd.f32 %v507_v48, %v478_v47 }
  0xbd   : > { %v1649_v56 = vmul.f32 0.05103104, %v535_v50 }
  0xc2   : > { %v536_v52 = vpop.f32.mrf.mxu2  ;;  %v481_v54 = vpop.f32.mrf.mxu0 }
  0xc3   : > { %v537_v53 = vadd.f32 %v536_v52, %v508_v51  ;;  %v510_v55 = vpop.f32.mrf.mxu1 }
  0xc4   : > { %v511_v62 = vadd.f32 %v510_v55, %v481_v54 }
  0xc5   : > { %v642_v57 = vmul.f32 0.05103104, %v537_v53  ;;  %v653_v12 = vpack.c.bf16 %v537_v53, %v535_v50 }
  0xc7   : > { %v649_v58 = vpack.c.bf16 %v642_v57, %v1649_v56  ;;  %v1198_v56 = vld [vmem:[%s1942_s1 + $0x74] sm:$0xf]  ;;  %v1039_v57 = vld [vmem:[%s1942_s1 + $0x78] sm:$0xf0] }
  0xca   : > { %v539_v59 = vpop.f32.mrf.mxu2  ;;  %v483_v60 = vpop.f32.mrf.mxu0 }
  0xcb   : > { %v512_v61 = vpop.f32.mrf.mxu1  ;;  %v540_v63 = vadd.f32 %v539_v59, %v511_v62  ;;  %v1196_v59 = vld [vmem:[%s1942_s1 + $0x64] sm:$0xf]  ;;  %v1103_v62 = vld [vmem:[%s1942_s1 + $0xf8] sm:$0xf0] }
  0xcc   : > { %v513_v0 = vadd.f32 %v512_v61, %v483_v60  ;;  %v1042_v60 = vor.u32 %v1198_v56, %v1039_v57  ;;  %v1031_v61 = vld [vmem:[%s1942_s1 + $0x68] sm:$0xf0]  ;;  %v1204_v56 = vld [vmem:[%s1942_s1 + $0xa4] sm:$0xf] }
  0xcd   : > { %v643_v5 = vmul.f32 0.05103104, %v540_v63  ;;  %v1220_v57 = vld [vmem:[%s1942_s1 + $0x124] sm:$0xf] }
  0xce   : > { %554 = vmatpush.bf16.msra.mxu3 %v1042_v60  ;;  %v1186_v60 = vld [vmem:[%s1942_s1 + $0x14] sm:$0xf] }
  0xd2   : > { %v541_v1 = vpop.f32.mrf.mxu2  ;;  %v486_v3 = vpop.f32.mrf.mxu0 }
  0xd3   : > { %v542_v2 = vadd.f32 %v541_v1, %v513_v0  ;;  %v515_v4 = vpop.f32.mrf.mxu1  ;;  %v1230_v0 = vld [vmem:[%s1942_s1 + $0x174] sm:$0xf]  ;;  %v1034_v1 = vor.u32 %v1196_v59, %v1031_v61  ;;  %v1127_v59 = vld [vmem:[%s1942_s1 + $0x128] sm:$0xf0]  ;;  %v991_v61 = vld [vmem:[%s1942_s1 + $0x18] sm:$0xf0] }
  0xd4   : > { %v516_v13 = vadd.f32 %v515_v4, %v486_v3  ;;  %v1212_v3 = vld [vmem:[%s1942_s1 + $0xe4] sm:$0xf]  ;;  %v1095_v4 = vld [vmem:[%s1942_s1 + $0xe8] sm:$0xf0] }
  0xd5   : > { %v644_v6 = vmul.f32 0.05103104, %v542_v2  ;;  %v654_v7 = vpack.c.bf16 %v542_v2, %v540_v63  ;;  %v1167_v2 = vld [vmem:[%s1942_s1 + $0x178] sm:$0xf0]  ;;  %555 = vmatpush.bf16.msra.mxu3 %v1034_v1  ;;  %v994_v1 = vor.u32 %v1186_v60, %v991_v61 }
  0xd7   : > { %663 = vrot.lane.b32.xlu1 %v654_v7, %s1372_s24  ;;  %v650_v8 = vpack.c.bf16 %v644_v6, %v643_v5  ;;  %v1194_v5 = vld [vmem:[%s1942_s1 + $0x54] sm:$0xf]  ;;  %v1023_v6 = vld [vmem:[%s1942_s1 + $0x58] sm:$0xf0]  ;;  %v1170_v7 = vor.u32 %v1230_v0, %v1167_v2  ;;  %v1130_v0 = vor.u32 %v1220_v57, %v1127_v59 }
  0xd8   : > { %v1218_v2 = vld [vmem:[%s1942_s1 + $0x114] sm:$0xf] }
  0xd9   : > { %612 = vmatpush.bf16.msrb.mxu1 %v1170_v7  ;;  %v1200_v7 = vld [vmem:[%s1942_s1 + $0x84] sm:$0xf] }
  0xda   : > { %v544_v9 = vpop.f32.mrf.mxu2  ;;  %v488_v10 = vpop.f32.mrf.mxu0 }
  0xdb   : > { %v517_v11 = vpop.f32.mrf.mxu1  ;;  %v545_v17 = vadd.f32 %v544_v9, %v516_v13  ;;  %v1228_v9 = vld [vmem:[%s1942_s1 + $0x164] sm:$0xf] }
  0xdc   : > { %v518_v18 = vadd.f32 %v517_v11, %v488_v10  ;;  %v1159_v10 = vld [vmem:[%s1942_s1 + $0x168] sm:$0xf0]  ;;  %v1210_v11 = vld [vmem:[%s1942_s1 + $0xd4] sm:$0xf] }
  0xdd   : > { %v1654_v26 = vmul.f32 0.05103104, %v545_v17  ;;  %v1162_v13 = vor.u32 %v1228_v9, %v1159_v10 }
  0xdf   : > { %661 = vrot.lane.b32.xlu1 %v653_v12, %s1372_s24  ;;  %v1087_v12 = vld [vmem:[%s1942_s1 + $0xd8] sm:$0xf0]  ;;  %613 = vmatpush.bf16.msrb.mxu1 %v1162_v13 }
  0xe2   : > { %v546_v19 = vpop.f32.mrf.mxu2  ;;  %v491_v21 = vpop.f32.mrf.mxu0 }
  0xe3   : > { %v547_v20 = vadd.f32 %v546_v19, %v518_v18  ;;  %v520_v22 = vpop.f32.mrf.mxu1  ;;  %v1226_v18 = vld [vmem:[%s1942_s1 + $0x154] sm:$0xf]  ;;  %v1151_v19 = vld [vmem:[%s1942_s1 + $0x158] sm:$0xf0] }
  0xe4   : > { %v521_v30 = vadd.f32 %v520_v22, %v491_v21  ;;  %v1015_v21 = vld [vmem:[%s1942_s1 + $0x48] sm:$0xf0]  ;;  %v1090_v22 = vor.u32 %v1210_v11, %v1087_v12  ;;  %v1216_v11 = vld [vmem:[%s1942_s1 + $0x104] sm:$0xf] }
  0xe5   : > { %v1656_v27 = vmul.f32 0.05103104, %v547_v20  ;;  %v655_v47 = vpack.c.bf16 %v547_v20, %v545_v17  ;;  %v1026_v17 = vor.u32 %v1194_v5, %v1023_v6  ;;  %v1192_v20 = vld [vmem:[%s1942_s1 + $0x44] sm:$0xf]  ;;  %v983_v5 = vld [vmem:[%s1942_s1 + $0x8] sm:$0xf0] }
  0xe6   : > { %v1111_v12 = vld [vmem:[%s1942_s1 + $0x108] sm:$0xf0] }
  0xe7   : > { %v651_v28 = vpack.c.bf16 %v1656_v27, %v1654_v26  ;;  %556 = vmatpush.bf16.msra.mxu3 %v1026_v17  ;;  %v1063_v26 = vld [vmem:[%s1942_s1 + $0xa8] sm:$0xf0]  ;;  %v1114_v17 = vor.u32 %v1216_v11, %v1111_v12 }
  0xea   : > { %v549_v29 = vpop.f32.mrf.mxu2  ;;  %v493_v31 = vpop.f32.mrf.mxu0 }
  0xeb   : > { %v522_v35 = vpop.f32.mrf.mxu1  ;;  %v550_v36 = vadd.f32 %v549_v29, %v521_v30  ;;  %v1208_v29 = vld [vmem:[%s1942_s1 + $0xc4] sm:$0xf]  ;;  %v1079_v30 = vld [vmem:[%s1942_s1 + $0xc8] sm:$0xf0] }
  0xec   : > { %v523_v37 = vadd.f32 %v522_v35, %v493_v31  ;;  %v1154_v31 = vor.u32 %v1226_v18, %v1151_v19  ;;  %v1018_v35 = vor.u32 %v1192_v20, %v1015_v21 }
  0xed   : > { %v1660_v40 = vmul.f32 0.05103104, %v550_v36 }
  0xee   : > { %614 = vmatpush.bf16.msrb.mxu1 %v1154_v31  ;;  %557 = vmatpush.bf16.msra.mxu3 %v1018_v35 }
  0xf2   : > { %v551_v38 = vpop.f32.mrf.mxu2 }
  0xf3   : > { %v552_v39 = vadd.f32 %v551_v38, %v523_v37  ;;  %v1143_v37 = vld [vmem:[%s1942_s1 + $0x148] sm:$0xf0]  ;;  %v1190_v38 = vld [vmem:[%s1942_s1 + $0x34] sm:$0xf] }
  0xf5   : > { %v1662_v44 = vmul.f32 0.05103104, %v552_v39  ;;  %v656_v45 = vpack.c.bf16 %v552_v39, %v550_v36  ;;  %v1224_v36 = vld [vmem:[%s1942_s1 + $0x144] sm:$0xf]  ;;  %v1007_v39 = vld [vmem:[%s1942_s1 + $0x38] sm:$0xf0] }
  0xf7   : > { %667 = vrot.lane.b32.xlu0 %v656_v45, %s1372_s24  ;;  %v652_v46 = vpack.c.bf16 %v1662_v44, %v1660_v40  ;;  %v1082_v45 = vor.u32 %v1208_v29, %v1079_v30 }
  0xff   : > { %665 = vrot.lane.b32.xlu0 %v655_v47, %s1372_s24  ;;  %v1206_v47 = vld [vmem:[%s1942_s1 + $0xb4] sm:$0xf] }
 0x149   : > { %v664_v52 = vpop.permute.xlu1 %663 }
 0x14a   : > { %v686_v53 = vsel %vm669_vm0, %v664_v52, 0  ;;  %v1135_v52 = vld [vmem:[%s1942_s1 + $0x138] sm:$0xf0] }
 0x151   : > { %v662_v54 = vpop.permute.xlu1 %661 }
 0x152   : > { %v683_v55 = vsel %vm669_vm0, %v662_v54, 0  ;;  %v999_v54 = vld [vmem:[%s1942_s1 + $0x28] sm:$0xf0] }
 0x169   : > { %v668_v48 = vpop.permute.xlu0 %667 }
 0x16a   : > { %v692_v49 = vsel %vm669_vm0, %v668_v48, 0  ;;  %v1071_v48 = vld [vmem:[%s1942_s1 + $0xb8] sm:$0xf0] }
 0x16b   : > { %698 = vmatpush.bf16.xpose.msrb.mxu2 %v692_v49  ;;  %v1146_v49 = vor.u32 %v1224_v36, %v1143_v37 }
 0x16d   : > { %615 = vmatpush.bf16.msrb.mxu1 %v1146_v49 }
 0x171   : > { %v666_v50 = vpop.permute.xlu0 %665 }
 0x172   : > { %v689_v51 = vsel %vm669_vm0, %v666_v50, 0  ;;  %v1010_v50 = vor.u32 %v1190_v38, %v1007_v39 }
 0x173   : > { %699 = vmatpush.bf16.xpose.msrb.mxu2 %v689_v51  ;;  %v1222_v51 = vld [vmem:[%s1942_s1 + $0x134] sm:$0xf] }
 0x174   : > { %v1138_v27 = vor.u32 %v1222_v51, %v1135_v52  ;;  %558 = vmatpush.bf16.msra.mxu3 %v1010_v50 }
 0x176   : > { %616 = vmatpush.bf16.msrb.mxu1 %v1138_v27 }
 0x17a   : > { %617 = vmatpush.bf16.msrb.mxu1 %v1130_v0 }
 0x17b   : > { %700 = vmatpush.bf16.xpose.msrb.mxu2 %v686_v53  ;;  %v1188_v53 = vld [vmem:[%s1942_s1 + $0x24] sm:$0xf] }
 0x183   : > { %701 = vmatpush.bf16.xpose.msrb.mxu2 %v683_v55  ;;  %v1074_v55 = vor.u32 %v1206_v47, %v1071_v48 }
 0x18a   : > { %1171 = vmatmul.msk.bf16.vlgmr.msrb.gmra.mxu2 %vm669_vm0, %v649_v58  ;;  %v1214_v58 = vld [vmem:[%s1942_s1 + $0xf4] sm:$0xf] }
 0x18b   : > { %v1106_v63 = vor.u32 %v1214_v58, %v1103_v62  ;;  %v1066_v58 = vor.u32 %v1204_v56, %v1063_v26  ;;  %v1202_v62 = vld [vmem:[%s1942_s1 + $0x94] sm:$0xf] }
 0x18d   : > { %583 = vmatpush.bf16.msrb.mxu0 %v1106_v63  ;;  %v1055_v63 = vld [vmem:[%s1942_s1 + $0x98] sm:$0xf0] }
 0x18e   : > { %v1058_v6 = vor.u32 %v1202_v62, %v1055_v63 }
 0x19a   : > { %1172 = vmatmul.msk.bf16.gmra.mxu2 %vm669_vm0, %v650_v8  ;;  %v1098_v8 = vor.u32 %v1212_v3, %v1095_v4  ;;  %v1119_v3 = vld [vmem:[%s1942_s1 + $0x118] sm:$0xf0]  ;;  %v1184_v4 = vld [vmem:[%s1942_s1 + $0x4] sm:$0xf] }
 0x19b   : > { %v1122_v9 = vor.u32 %v1218_v2, %v1119_v3  ;;  %v986_v10 = vor.u32 %v1184_v4, %v983_v5 }
 0x19c   : > { %584 = vmatpush.bf16.msrb.mxu0 %v1098_v8  ;;  %v1047_v8 = vld [vmem:[%s1942_s1 + $0x88] sm:$0xf0] }
 0x19d   : > { %v1050_v13 = vor.u32 %v1200_v7, %v1047_v8  ;;  %618 = vmatpush.bf16.msrb.mxu1 %v1122_v9 }
 0x1a0   : > { %585 = vmatpush.bf16.msrb.mxu0 %v1090_v22 }
 0x1a1   : > { %619 = vmatpush.bf16.msrb.mxu1 %v1114_v17 }
 0x1a4   : > { %586 = vmatpush.bf16.msrb.mxu0 %v1082_v45  ;;  %620 = vmatmul.bf16.vlgmr.msrb.gmra.mxu1 %v1599_v16 }
 0x1a8   : > { %587 = vmatpush.bf16.msrb.mxu0 %v1074_v55 }
 0x1aa   : > { %1173 = vmatmul.msk.bf16.gmra.mxu2 %vm669_vm0, %v651_v28  ;;  %v1002_v28 = vor.u32 %v1188_v53, %v999_v54 }
 0x1ac   : > { %559 = vmatpush.bf16.msra.mxu3 %v1002_v28  ;;  %588 = vmatpush.bf16.msrb.mxu0 %v1066_v58 }
 0x1b0   : > { %560 = vmatpush.bf16.msra.mxu3 %v994_v1  ;;  %589 = vmatpush.bf16.msrb.mxu0 %v1058_v6 }
 0x1b4   : > { %561 = vmatpush.bf16.msra.mxu3 %v986_v10  ;;  %590 = vmatpush.bf16.msrb.mxu0 %v1050_v13 }
 0x1b5   : > { %625 = vmatmul.bf16.gmra.mxu1 %v1614_v25 }
 0x1b7   : > { %562 = vmatmul.bf16.vlgmr.msra.gmra.mxu3 %v1595_v14  ;;  %591 = vmatmul.bf16.vlgmr.msrb.gmra.mxu0 %v1597_v15  ;;  %v723_v14 = vlaneseq }
 0x1b9   : > { %v724_v15 = vshrl.u32 %v723_v14, 7  ;;  %v733_v16 = vand.u32 127, %v723_v14 }
 0x1ba   : > { %1174 = vmatmul.msk.bf16.gmra.mxu2 %vm669_vm0, %v652_v46 }
 0x1bb   : > { %vm734_vm1 = vcmp.ge.s32.totalorder %v724_v15, %v733_v16  ;;  %v727_v46 = vadd.s32 24, %v724_v15  ;;  %v728_v21 = vadd.s32 32, %v724_v15  ;;  %v729_v31 = vadd.s32 40, %v724_v15 }
 0x1bc   : > { %v730_v38 = vadd.s32 48, %v724_v15  ;;  %v731_v48 = vadd.s32 56, %v724_v15 }
 0x1bd   : > { %vm737_vm4 = vcmp.ge.s32.totalorder %v727_v46, %v733_v16  ;;  %vm738_vm5 = vcmp.ge.s32.totalorder %v728_v21, %v733_v16  ;;  %vm739_vm6 = vcmp.ge.s32.totalorder %v729_v31, %v733_v16 }
 0x1be   : > { %vm740_vm7 = vcmp.ge.s32.totalorder %v730_v38, %v733_v16  ;;  %vm741_vm8 = vcmp.ge.s32.totalorder %v731_v48, %v733_v16 }
 0x1c5   : > { %630 = vmatmul.bf16.gmra.mxu1 %v1629_v34 }
 0x1c7   : > { %567 = vmatmul.bf16.gmra.mxu3 %v1610_v23  ;;  %596 = vmatmul.bf16.gmra.mxu0 %v1612_v24 }
 0x1d5   : > { %635 = vmatmul.bf16.gmra.mxu1 %v1644_v43 }
 0x1d7   : > { %572 = vmatmul.bf16.gmra.mxu3 %v1625_v32  ;;  %601 = vmatmul.bf16.gmra.mxu0 %v1627_v33  ;;  %v725_v32 = vadd.s32 8, %v724_v15 }
 0x1d9   : > { %vm735_vm2 = vcmp.ge.s32.totalorder %v725_v32, %v733_v16 }
 0x1e7   : > { %577 = vmatmul.bf16.gmra.mxu3 %v1640_v41  ;;  %606 = vmatmul.bf16.gmra.mxu0 %v1642_v42  ;;  %v726_v42 = vadd.s32 16, %v724_v15 }
 0x1e9   : > { %vm736_vm3 = vcmp.ge.s32.totalorder %v726_v42, %v733_v16 }
 0x20d   : > { %v703_v23 = vpop.f32.mrf.mxu2 }
 0x20e   : > { %v1838_v24 = vsel %vm734_vm1, %v703_v23, -1e+30 }
 0x20f   : > { %v750_v25 = vsel %vm669_vm0, %v1838_v24, -inf }
 0x210   : > { %751 = vmax.xlane.f32.xlu2 %v750_v25 }
 0x215   : > { %v705_v33 = vpop.f32.mrf.mxu2 }
 0x216   : > { %v1842_v34 = vsel %vm735_vm2, %v705_v33, -1e+30 }
 0x217   : > { %v753_v41 = vsel %vm669_vm0, %v1842_v34, -inf }
 0x218   : > { %754 = vmax.xlane.f32.xlu2 %v753_v41 }
 0x21d   : > { %v708_v43 = vpop.f32.mrf.mxu2 }
 0x21e   : > { %v1846_v40 = vsel %vm736_vm3, %v708_v43, -1e+30 }
 0x21f   : > { %v756_v44 = vsel %vm669_vm0, %v1846_v40, -inf }
 0x220   : > { %757 = vmax.xlane.f32.xlu0 %v756_v44 }
 0x221   : > { %v621_v52 = vpop.f32.mrf.mxu1 }
 0x225   : > { %v710_v18 = vpop.f32.mrf.mxu2 }
 0x226   : > { %v1850_v19 = vsel %vm737_vm4, %v710_v18, -1e+30 }
 0x227   : > { %v759_v20 = vsel %vm669_vm0, %v1850_v19, -inf }
 0x228   : > { %760 = vmax.xlane.f32.xlu1 %v759_v20 }
 0x229   : > { %v623_v28 = vpop.f32.mrf.mxu1 }
 0x22d   : > { %v713_v22 = vpop.f32.mrf.mxu2 }
 0x22e   : > { %v1854_v29 = vsel %vm738_vm5, %v713_v22, -1e+30 }
 0x22f   : > { %v762_v30 = vsel %vm669_vm0, %v1854_v29, -inf }
 0x230   : > { %763 = vmax.xlane.f32.xlu2 %v762_v30 }
 0x232   : > { %v626_v60 = vpop.f32.mrf.mxu1 }
 0x234   : > { %v592_v50 = vpop.f32.mrf.mxu0 }
 0x235   : > { %v715_v35 = vpop.f32.mrf.mxu2 }
 0x236   : > { %v1858_v36 = vsel %vm739_vm6, %v715_v35, -1e+30 }
 0x237   : > { %v765_v37 = vsel %vm669_vm0, %v1858_v36, -inf }
 0x238   : > { %766 = vmax.xlane.f32.xlu2 %v765_v37 }
 0x23a   : > { %v563_v49 = vpop.f32.mrf.mxu3  ;;  %v628_v62 = vpop.f32.mrf.mxu1 }
 0x23b   : > { %v593_v51 = vadd.f32 %v592_v50, %v563_v49 }
 0x23c   : > { %v594_v27 = vpop.f32.mrf.mxu0 }
 0x23d   : > { %v718_v39 = vpop.f32.mrf.mxu2  ;;  %v1866_v53 = vadd.f32 %v621_v52, %v593_v51 }
 0x23e   : > { %v1862_v45 = vsel %vm740_vm7, %v718_v39, -1e+30 }
 0x23f   : > { %v768_v47 = vsel %vm669_vm0, %v1862_v45, -inf }
 0x240   : > { %769 = vmax.xlane.f32.xlu2 %v768_v47 }
 0x242   : > { %v565_v26 = vpop.f32.mrf.mxu3  ;;  %v631_v1 = vpop.f32.mrf.mxu1 }
 0x243   : > { %v595_v35 = vadd.f32 %v594_v27, %v565_v26 }
 0x244   : > { %v597_v59 = vpop.f32.mrf.mxu0 }
 0x245   : > { %v720_v54 = vpop.f32.mrf.mxu2  ;;  %v624_v49 = vadd.f32 %v623_v28, %v595_v35 }
 0x246   : > { %v1868_v55 = vsel %vm741_vm8, %v720_v54, -1e+30 }
 0x247   : > { %v771_v56 = vsel %vm669_vm0, %v1868_v55, -inf  ;;  %v842_v54 = vpack.c.bf16 %v624_v49, %v1866_v53 }
 0x248   : > { %772 = vmax.xlane.f32.xlu2 %v771_v56 }
 0x24a   : > { %v568_v57 = vpop.f32.mrf.mxu3  ;;  %v633_v4 = vpop.f32.mrf.mxu1 }
 0x24b   : > { %v598_v22 = vadd.f32 %v597_v59, %v568_v57 }
 0x24c   : > { %v599_v58 = vpop.f32.mrf.mxu0 }
 0x252   : > { %v570_v61 = vpop.f32.mrf.mxu3  ;;  %v636_v10 = vpop.f32.mrf.mxu1 }
 0x253   : > { %v600_v30 = vadd.f32 %v599_v58, %v570_v61 }
 0x254   : > { %v602_v0 = vpop.f32.mrf.mxu0 }
 0x255   : > { %v629_v39 = vadd.f32 %v628_v62, %v600_v30 }
 0x25a   : > { %v573_v63 = vpop.f32.mrf.mxu3  ;;  %v638_v25 = vpop.f32.mrf.mxu1 }
 0x25b   : > { %v603_v32 = vadd.f32 %v602_v0, %v573_v63 }
 0x25c   : > { %v604_v3 = vpop.f32.mrf.mxu0 }
 0x25d   : > { %v632_v18 = vadd.f32 %v631_v1, %v603_v32 }
 0x262   : > { %v575_v2 = vpop.f32.mrf.mxu3 }
 0x263   : > { %v605_v33 = vadd.f32 %v604_v3, %v575_v2 }
 0x264   : > { %v607_v9 = vpop.f32.mrf.mxu0 }
 0x265   : > { %v634_v20 = vadd.f32 %v633_v4, %v605_v33 }
 0x267   : > { %v844_v37 = vpack.c.bf16 %v634_v20, %v632_v18 }
 0x26a   : > { %v578_v8 = vpop.f32.mrf.mxu3 }
 0x26b   : > { %v608_v15 = vadd.f32 %v607_v9, %v578_v8 }
 0x26c   : > { %v609_v23 = vpop.f32.mrf.mxu0 }
 0x26d   : > { %v637_v43 = vadd.f32 %v636_v10, %v608_v15 }
 0x272   : > { %v580_v16 = vpop.f32.mrf.mxu3 }
 0x283   : > { %v752_v5 = vpop.xlane.xlu2 %751 }
 0x284   : > { %v774_v6 = vsub.f32 %v1838_v24, %v752_v5  ;;  %v610_v24 = vadd.f32 %v609_v23, %v580_v16 }
 0x286   : > { %v782_v7 = vmul.f32 1.442695, %v774_v6 }
 0x288   : > { %1276 = vpow2.f32 %v782_v7 }
 0x28b   : > { %v755_v11 = vpop.xlane.xlu2 %754 }
 0x28c   : > { %v775_v12 = vsub.f32 %v1842_v34, %v755_v11  ;;  %v639_v34 = vadd.f32 %v638_v25, %v610_v24 }
 0x28e   : > { %v1874_v13 = vpop.eup %1276  ;;  %v784_v17 = vmul.f32 1.442695, %v775_v12  ;;  %v845_v31 = vpack.c.bf16 %v639_v34, %v637_v43 }
 0x28f   : > { %v798_v14 = vsel %vm669_vm0, %v1874_v13, 0.0 }
 0x290   : > { %1278 = vpow2.f32 %v784_v17  ;;  %799 = vadd.xlane.f32.xlu2 %v798_v14  ;;  %862 = vmatpush.bf16.msrb.mxu3 %v845_v31 }
 0x293   : > { %v758_v41 = vpop.xlane.xlu0 %757 }
 0x294   : > { %v776_v42 = vsub.f32 %v1846_v40, %v758_v41  ;;  %v627_v40 = vadd.f32 %v626_v60, %v598_v22  ;;  %863 = vmatpush.bf16.msrb.mxu3 %v844_v37 }
 0x296   : > { %v1879_v44 = vpop.eup %1278  ;;  %v786_v46 = vmul.f32 1.442695, %v776_v42  ;;  %v843_v52 = vpack.c.bf16 %v629_v39, %v627_v40 }
 0x297   : > { %v801_v21 = vsel %vm669_vm0, %v1879_v44, 0.0 }
 0x298   : > { %1280 = vpow2.f32 %v786_v46  ;;  %802 = vadd.xlane.f32.xlu2 %v801_v21  ;;  %864 = vmatpush.bf16.msrb.mxu3 %v843_v52 }
 0x29b   : > { %v761_v38 = vpop.xlane.xlu1 %760 }
 0x29c   : > { %v777_v47 = vsub.f32 %v1850_v19, %v761_v38  ;;  %865 = vmatpush.bf16.msrb.mxu3 %v842_v54 }
 0x29e   : > { %v1281_v48 = vpop.eup %1280  ;;  %v788_v50 = vmul.f32 1.442695, %v777_v47 }
 0x29f   : > { %v804_v51 = vsel %vm669_vm0, %v1281_v48, 0.0 }
 0x2a0   : > { %1282 = vpow2.f32 %v788_v50  ;;  %805 = vadd.xlane.f32.xlu0 %v804_v51 }
 0x2a3   : > { %v764_v56 = vpop.xlane.xlu2 %763 }
 0x2a4   : > { %v778_v26 = vsub.f32 %v1854_v29, %v764_v56 }
 0x2a6   : > { %v1283_v27 = vpop.eup %1282  ;;  %v790_v57 = vmul.f32 1.442695, %v778_v26 }
 0x2a7   : > { %v807_v19 = vsel %vm669_vm0, %v1283_v27, 0.0 }
 0x2a8   : > { %1284 = vpow2.f32 %v790_v57  ;;  %808 = vadd.xlane.f32.xlu1 %v807_v19 }
 0x2ab   : > { %v767_v28 = vpop.xlane.xlu2 %766 }
 0x2ac   : > { %v779_v59 = vsub.f32 %v1858_v36, %v767_v28 }
 0x2ae   : > { %v1285_v60 = vpop.eup %1284  ;;  %v792_v61 = vmul.f32 1.442695, %v779_v59 }
 0x2af   : > { %v810_v58 = vsel %vm669_vm0, %v1285_v60, 0.0 }
 0x2b0   : > { %1286 = vpow2.f32 %v792_v61  ;;  %811 = vadd.xlane.f32.xlu2 %v810_v58 }
 0x2b3   : > { %v770_v53 = vpop.xlane.xlu2 %769 }
 0x2b4   : > { %v780_v62 = vsub.f32 %v1862_v45, %v770_v53 }
 0x2b6   : > { %v1287_v29 = vpop.eup %1286  ;;  %v794_v63 = vmul.f32 1.442695, %v780_v62 }
 0x2b7   : > { %v813_v0 = vsel %vm669_vm0, %v1287_v29, 0.0 }
 0x2b8   : > { %1288 = vpow2.f32 %v794_v63  ;;  %814 = vadd.xlane.f32.xlu0 %v813_v0 }
 0x2bb   : > { %v773_v1 = vpop.xlane.xlu2 %772 }
 0x2bc   : > { %v781_v2 = vsub.f32 %v1868_v55, %v773_v1 }
 0x2be   : > { %v1289_v3 = vpop.eup %1288  ;;  %v796_v36 = vmul.f32 1.442695, %v781_v2 }
 0x2bf   : > { %v816_v4 = vsel %vm669_vm0, %v1289_v3, 0.0 }
 0x2c0   : > { %1290 = vpow2.f32 %v796_v36  ;;  %817 = vadd.xlane.f32.xlu1 %v816_v4 }
 0x2c6   : > { %v1291_v5 = vpop.eup %1290 }
 0x2c7   : > { %v819_v6 = vsel %vm669_vm0, %v1291_v5, 0.0 }
 0x2c8   : > { %820 = vadd.xlane.f32.xlu2 %v819_v6 }
 0x303   : > { %v800_v45 = vpop.xlane.xlu2 %799 }
 0x304   : > { %1292 = vrcp.f32 %v800_v45 }
 0x30a   : > { %v1293_v8 = vpop.eup %1292 }
 0x30b   : > { %v803_v7 = vpop.xlane.xlu2 %802  ;;  %v830_v10 = vmul.f32 %v1293_v8, %v1874_v13 }
 0x30c   : > { %1294 = vrcp.f32 %v803_v7 }
 0x312   : > { %v1295_v9 = vpop.eup %1294 }
 0x313   : > { %v831_v55 = vmul.f32 %v1295_v9, %v1879_v44  ;;  %v806_v12 = vpop.xlane.xlu0 %805 }
 0x314   : > { %1296 = vrcp.f32 %v806_v12 }
 0x315   : > { %v838_v11 = vpack.c.bf16 %v831_v55, %v830_v10 }
 0x317   : > { %1175 = vmatmul.msk.bf16.vlgmr.msrb.gmra.mxu3 %vm669_vm0, %v838_v11 }
 0x31a   : > { %v1297_v14 = vpop.eup %1296 }
 0x31b   : > { %v809_v17 = vpop.xlane.xlu1 %808  ;;  %v832_v16 = vmul.f32 %v1297_v14, %v1281_v48 }
 0x31c   : > { %1298 = vrcp.f32 %v809_v17 }
 0x322   : > { %v1299_v15 = vpop.eup %1298 }
 0x323   : > { %v833_v23 = vmul.f32 %v1299_v15, %v1283_v27  ;;  %v812_v25 = vpop.xlane.xlu2 %811 }
 0x324   : > { %1300 = vrcp.f32 %v812_v25 }
 0x325   : > { %v839_v24 = vpack.c.bf16 %v833_v23, %v832_v16 }
 0x327   : > { %1176 = vmatmul.msk.bf16.gmra.mxu3 %vm669_vm0, %v839_v24 }
 0x32a   : > { %v1301_v13 = vpop.eup %1300 }
 0x32b   : > { %v815_v32 = vpop.xlane.xlu0 %814  ;;  %v834_v41 = vmul.f32 %v1301_v13, %v1285_v60 }
 0x32c   : > { %1302 = vrcp.f32 %v815_v32 }
 0x332   : > { %v1303_v33 = vpop.eup %1302 }
 0x333   : > { %v835_v42 = vmul.f32 %v1303_v33, %v1287_v29  ;;  %v818_v34 = vpop.xlane.xlu1 %817 }
 0x334   : > { %1304 = vrcp.f32 %v818_v34 }
 0x335   : > { %v840_v43 = vpack.c.bf16 %v835_v42, %v834_v41 }
 0x337   : > { %1177 = vmatmul.msk.bf16.gmra.mxu3 %vm669_vm0, %v840_v43 }
 0x33a   : > { %v1305_v46 = vpop.eup %1304 }
 0x33b   : > { %v821_v44 = vpop.xlane.xlu2 %820  ;;  %v836_v20 = vmul.f32 %v1305_v46, %v1289_v3 }
 0x33c   : > { %1306 = vrcp.f32 %v821_v44 }
 0x342   : > { %v1307_v18 = vpop.eup %1306 }
 0x343   : > { %v837_v21 = vmul.f32 %v1307_v18, %v1291_v5 }
 0x345   : > { %v841_v22 = vpack.c.bf16 %v837_v21, %v836_v20 }
 0x347   : > { %1178 = vmatmul.msk.bf16.gmra.mxu3 %vm669_vm0, %v841_v22 }
 0x39a   : > { %v867_v30 = vpop.f32.mrf.mxu3 }
 0x39b   : > { %887 = vst.msk [vmem:[%s136_s3] sm:$0xff] %vm669_vm0, %v867_v30 }
 0x3a2   : > { %v869_v31 = vpop.f32.mrf.mxu3 }
 0x3a3   : > { %888 = vst.msk [vmem:[%s136_s3 + $0x8] sm:$0xff] %vm669_vm0, %v869_v31 }
 0x3aa   : > { %v872_v35 = vpop.f32.mrf.mxu3 }
 0x3ab   : > { %889 = vst.msk [vmem:[%s136_s3 + $0x10] sm:$0xff] %vm669_vm0, %v872_v35 }
 0x3b2   : > { %v874_v37 = vpop.f32.mrf.mxu3 }
 0x3b3   : > { %890 = vst.msk [vmem:[%s136_s3 + $0x18] sm:$0xff] %vm669_vm0, %v874_v37 }
 0x3ba   : > { %v877_v38 = vpop.f32.mrf.mxu3 }
 0x3bb   : > { %891 = vst.msk [vmem:[%s136_s3 + $0x20] sm:$0xff] %vm669_vm0, %v877_v38 }
 0x3c2   : > { %v879_v40 = vpop.f32.mrf.mxu3 }
 0x3c3   : > { %892 = vst.msk [vmem:[%s136_s3 + $0x28] sm:$0xff] %vm669_vm0, %v879_v40 }
 0x3ca   : > { %v882_v39 = vpop.f32.mrf.mxu3 }
 0x3cb   : > { %893 = vst.msk [vmem:[%s136_s3 + $0x30] sm:$0xff] %vm669_vm0, %v882_v39 }
 0x3d2   : > { %v884_v47 = vpop.f32.mrf.mxu3 }
 0x3d3   : > { %894 = vst.msk [vmem:[%s136_s3 + $0x38] sm:$0xff] %vm669_vm0, %v884_v47 }
 0x3d4   : > { %1335 = shalt.err (!%p1332_p3)
}
 0x3d5   : > { %s1373_s27 = smov 128   ;;  %s1374_s24 = smov 8  }
 0x3d6   : > { %1234 = dma.vmem_to_hbm [thread:$0]  (%p1428_p5), %s909_s8, 1024, %s911_s14, %s896_s16, %s1373_s27, %s1373_s27, %s1374_s24  }
 0x3d7 PF: > { %p1240_p4 = scmp.ge.s32.totalorder %s1370_s12, 2  ;;  %s925_s28 = sand.u32 1, %s1358_s9  }
 0x3d8   : > { %s926_s29 = scalar_lea.sflag [#allocation3], %s925_s28 }
 0x3d9   : > { %p1237_p7 = pnand %p1240_p4, %p1432_p6 }
 0x3db   : > { %p1238_p8 = pneg %p1237_p7 }
 0x3dd   : > { %1353 = dma.done.wait (%p1238_p8), %s926_s29, 1024  }
 0x3de   : > { %1355 = vsyncadd (%p1238_p8), %s926_s29, 4294966272  ;;  %p12_p9 = scmp.ge.s32.totalorder %s1415_s15, 4   ;;  %s1946_s9 = smov %s1362_s10 }
 0x3df   : > { %s1947_s10 = smov %s1366_s11  ;;  %s1948_s11 = smov %s1426_s18 }
 0x3e0   : > { %s1949_s12 = smov %s1415_s15  ;;  %14 = sbr.rel (!%p12_p9) target bundleno = 3 (0x3), region = 63 }
 0x3e5   :  { %932 = vsyncpa [#allocation3], 1 }
 0x3e6   :  { %934 = vsyncpa [#allocation3 + $0x1], 1 }

</bundles_post_ra>
